<compile_context>
chip_gen: v6e
topology: v6e:2x2x1
jax: 0.10.0
libtpu: 0.0.40
codegen_flags: <defaults>
</compile_context>

<pallas_src>
import jax
import jax.numpy as jnp
from jax.experimental import pallas as pl
from jax.experimental.pallas import tpu as pltpu

IN_FEATURES = 1 * 28 * 28   # 784
HIDDEN = 10
OUT_FEATURES = 2


def _mlp_kernel(x_ref, w1_ref, b1_ref, w2_ref, b2_ref, o_ref):
    # x tile: (TB, 784) f32; w1: (784, 10) f32; b1: (1, 10) f32;
    # w2: (10, 2) f32; b2: (1, 2) f32; out: (TB, 2) f32.
    # Cast the dominant operand to bf16 *in VMEM* (no extra HBM pass); the
    # MXU accumulates in f32 via preferred_element_type.
    x_bf16 = x_ref[...].astype(jnp.bfloat16)
    w1_bf16 = w1_ref[...].astype(jnp.bfloat16)        # tiny, hidden under x DMA
    h = jnp.dot(x_bf16, w1_bf16, preferred_element_type=jnp.float32)
    h = jnp.maximum(h + b1_ref[...], 0.0)             # bias + ReLU (f32)
    logits = jnp.dot(h, w2_ref[...],
                     preferred_element_type=jnp.float32) + b2_ref[...]
    # Numerically stable log_softmax over the 2 classes (f32).
    m = jnp.max(logits, axis=-1, keepdims=True)
    shifted = logits - m
    lse = jnp.log(jnp.sum(jnp.exp(shifted), axis=-1, keepdims=True))
    o_ref[...] = shifted - lse


def mnist_mlp_forward(x_nchw, w1, b1, w2, b2, *, block_b=2048):
    """x_nchw: (B, 1, 28, 28) float32 -> (B, 2) log-probabilities (float32)."""
    B = x_nchw.shape[0]

    # Wrapper glue is layout-only: reshape NCHW -> (B, 784).  No dtype convert
    # and no pad pass over x in HBM.
    x = x_nchw.reshape(B, IN_FEATURES).astype(jnp.float32)
    w1_f32 = w1.astype(jnp.float32)
    b1_2d = b1.reshape(1, HIDDEN).astype(jnp.float32)
    w2_f32 = w2.astype(jnp.float32)
    b2_2d = b2.reshape(1, OUT_FEATURES).astype(jnp.float32)

    # Batch tile.  A single full-extent block (tb == B) is always legal;
    # otherwise tb must be a multiple of 8 (sublane rule) and the last block
    # may be partial -- its undefined pad rows are independent and are never
    # written back (no cross-row reduction in the kernel).
    if B <= block_b:
        tb = B
    else:
        tb = max(8, (block_b // 8) * 8)
    grid = (pl.cdiv(B, tb),)

    flops = 2 * B * IN_FEATURES * HIDDEN + 2 * B * HIDDEN * OUT_FEATURES
    bytes_accessed = (B * IN_FEATURES * 4                          # x (f32, read once)
                      + IN_FEATURES * HIDDEN * 4                   # w1
                      + HIDDEN * 4                                 # b1
                      + HIDDEN * OUT_FEATURES * 4 + OUT_FEATURES * 4  # w2, b2
                      + B * OUT_FEATURES * 4)                      # output

    out = pl.pallas_call(
        _mlp_kernel,
        out_shape=jax.ShapeDtypeStruct((B, OUT_FEATURES), jnp.float32),
        grid=grid,
        in_specs=[
            pl.BlockSpec((tb, IN_FEATURES), lambda i: (i, 0)),       # x tiles (pipelined)
            pl.BlockSpec((IN_FEATURES, HIDDEN), lambda i: (0, 0)),   # w1 resident
            pl.BlockSpec((1, HIDDEN), lambda i: (0, 0)),             # b1 resident
            pl.BlockSpec((HIDDEN, OUT_FEATURES), lambda i: (0, 0)),  # w2 resident
            pl.BlockSpec((1, OUT_FEATURES), lambda i: (0, 0)),       # b2 resident
        ],
        out_specs=pl.BlockSpec((tb, OUT_FEATURES), lambda i: (i, 0)),
        compiler_params=pltpu.CompilerParams(
            dimension_semantics=("parallel",),     # batch tiles independent (v7x 2 TCs)
            vmem_limit_bytes=48 * 1024 * 1024,     # f32 x tiles x2 buffers + temps; < v7x 64 MiB
        ),
        cost_estimate=pl.CostEstimate(
            flops=flops,
            transcendentals=3 * B,                 # 2x exp + 1x log per row (approx.)
            bytes_accessed=bytes_accessed,
        ),
    )(x, w1_f32, b1_2d, w2_f32, b2_2d)

    return out


def init_params(key):
    # PyTorch nn.Linear default init: U(-1/sqrt(fan_in), 1/sqrt(fan_in))
    k1, k2, k3, k4 = jax.random.split(key, 4)
    fan1 = IN_FEATURES
    bound1 = 1.0 / jnp.sqrt(fan1)
    w1 = jax.random.uniform(k1, (fan1, HIDDEN), jnp.float32, -bound1, bound1)
    b1 = jax.random.uniform(k2, (HIDDEN,), jnp.float32, -bound1, bound1)
    fan2 = HIDDEN
    bound2 = 1.0 / jnp.sqrt(fan2)
    w2 = jax.random.uniform(k3, (fan2, OUT_FEATURES), jnp.float32, -bound2, bound2)
    b2 = jax.random.uniform(k4, (OUT_FEATURES,), jnp.float32, -bound2, bound2)
    return w1, b1, w2, b2


def reference_forward(x_nchw, w1, b1, w2, b2):
    x = x_nchw.reshape(x_nchw.shape[0], -1)
    h = jnp.maximum(x @ w1 + b1, 0.0)
    logits = h @ w2 + b2
    return jax.nn.log_softmax(logits, axis=-1)


if __name__ == "__main__":
    key = jax.random.PRNGKey(0)
    kx, kp = jax.random.split(key)

    # Small MNIST-shaped batch.  B=20 with block_b=8 exercises the multi-tile
    # grid (3 tiles) and the unpadded partial-last-block path; the default
    # call exercises the single full-extent block path.
    B = 20
    x = jax.random.normal(kx, (B, 1, 28, 28), jnp.float32)
    w1, b1, w2, b2 = init_params(kp)

    ref = reference_forward(x, w1, b1, w2, b2)

    out_tiled = jax.block_until_ready(
        mnist_mlp_forward(x, w1, b1, w2, b2, block_b=8))
    out_full = jax.block_until_ready(
        mnist_mlp_forward(x, w1, b1, w2, b2))

    for out in (out_tiled, out_full):
        assert out.shape == (B, OUT_FEATURES)
        # bf16 is used only for the x/w1 MXU operands (cast in-kernel).
        assert jnp.allclose(out, ref, atol=3e-2, rtol=3e-2), (
            f"max abs diff {jnp.max(jnp.abs(out - ref))}")
    print("KERNEL_OK")
</pallas_src>

<mosaic_0001>
module attributes {stable_mosaic.version = 11 : i64} {
  func.func @_mlp_kernel(%arg0: i32, %arg1: memref<8x784xf32, #tpu.memory_space<vmem>>, %arg2: memref<784x10xf32, #tpu.memory_space<vmem>>, %arg3: memref<1x10xf32, #tpu.memory_space<vmem>>, %arg4: memref<10x2xf32, #tpu.memory_space<vmem>>, %arg5: memref<1x2xf32, #tpu.memory_space<vmem>>, %arg6: memref<8x2xf32, #tpu.memory_space<vmem>>) attributes {dimension_semantics = [#tpu.dimension_semantics<parallel>], iteration_bounds = array<i64: 3>, scalar_prefetch = 0 : i64, scratch_operands = 0 : i64, tpu.core_type = #tpu.core_type<tc>, window_params = [{transform_indices = @transform_0, window_bounds = array<i64: 8, 784>}, {pipeline_mode = #tpu.pipeline_mode<synchronous>, transform_indices = @transform_1, window_bounds = array<i64: 784, 10>}, {pipeline_mode = #tpu.pipeline_mode<synchronous>, transform_indices = @transform_2, window_bounds = array<i64: 1, 10>}, {pipeline_mode = #tpu.pipeline_mode<synchronous>, transform_indices = @transform_3, window_bounds = array<i64: 10, 2>}, {pipeline_mode = #tpu.pipeline_mode<synchronous>, transform_indices = @transform_4, window_bounds = array<i64: 1, 2>}, {transform_indices = @transform_5, window_bounds = array<i64: 8, 2>}]} {
    %c0 = arith.constant 0 : index
    %c0_0 = arith.constant 0 : index
    %0 = vector.load %arg1[%c0, %c0_0] : memref<8x784xf32, #tpu.memory_space<vmem>>, vector<8x784xf32>
    %1 = arith.truncf %0 : vector<8x784xf32> to vector<8x784xbf16>
    %c0_1 = arith.constant 0 : index
    %c0_2 = arith.constant 0 : index
    %2 = vector.load %arg2[%c0_1, %c0_2] : memref<784x10xf32, #tpu.memory_space<vmem>>, vector<784x10xf32>
    %3 = arith.truncf %2 : vector<784x10xf32> to vector<784x10xbf16>
    %cst = arith.constant dense<0.000000e+00> : vector<8x10xf32>
    %4 = tpu.matmul %1, %3, %cst {dimension_numbers = #tpu.dot_dimension_numbers<[1], [0], [0], [1], [0, 0, 1, 1], [], []>} : vector<8x784xbf16>, vector<784x10xbf16>, vector<8x10xf32> -> vector<8x10xf32>
    %c0_3 = arith.constant 0 : index
    %c0_4 = arith.constant 0 : index
    %5 = vector.load %arg3[%c0_3, %c0_4] : memref<1x10xf32, #tpu.memory_space<vmem>>, vector<1x10xf32>
    %6 = vector.broadcast %5 : vector<1x10xf32> to vector<8x10xf32>
    %7 = arith.addf %4, %6 : vector<8x10xf32>
    %cst_5 = arith.constant 0.000000e+00 : f32
    %8 = vector.broadcast %cst_5 : f32 to vector<8x10xf32>
    %9 = arith.maximumf %7, %8 : vector<8x10xf32>
    %c0_6 = arith.constant 0 : index
    %c0_7 = arith.constant 0 : index
    %10 = vector.load %arg4[%c0_6, %c0_7] : memref<10x2xf32, #tpu.memory_space<vmem>>, vector<10x2xf32>
    %cst_8 = arith.constant dense<0.000000e+00> : vector<8x2xf32>
    %11 = tpu.matmul %9, %10, %cst_8 {dimension_numbers = #tpu.dot_dimension_numbers<[1], [0], [0], [1], [0, 0, 1, 1], [], []>} : vector<8x10xf32>, vector<10x2xf32>, vector<8x2xf32> -> vector<8x2xf32>
    %c0_9 = arith.constant 0 : index
    %c0_10 = arith.constant 0 : index
    %12 = vector.load %arg5[%c0_9, %c0_10] : memref<1x2xf32, #tpu.memory_space<vmem>>, vector<1x2xf32>
    %13 = vector.broadcast %12 : vector<1x2xf32> to vector<8x2xf32>
    %14 = arith.addf %11, %13 : vector<8x2xf32>
    %cst_11 = arith.constant dense<0xFF800000> : vector<8xf32>
    %15 = vector.multi_reduction <maximumf>, %14, %cst_11 [1] : vector<8x2xf32> to vector<8xf32>
    %16 = vector.shape_cast %15 : vector<8xf32> to vector<8x1xf32>
    %17 = vector.broadcast %16 : vector<8x1xf32> to vector<8x2xf32>
    %18 = arith.subf %14, %17 : vector<8x2xf32>
    %19 = math.exp %18 : vector<8x2xf32>
    %cst_12 = arith.constant dense<0.000000e+00> : vector<8xf32>
    %20 = vector.multi_reduction <add>, %19, %cst_12 [1] : vector<8x2xf32> to vector<8xf32>
    %21 = vector.shape_cast %20 : vector<8xf32> to vector<8x1xf32>
    %22 = math.log %21 : vector<8x1xf32>
    %23 = vector.broadcast %22 : vector<8x1xf32> to vector<8x2xf32>
    %24 = arith.subf %18, %23 : vector<8x2xf32>
    %c0_13 = arith.constant 0 : index
    %c0_14 = arith.constant 0 : index
    %25 = vector.load %arg6[%c0_13, %c0_14] : memref<8x2xf32, #tpu.memory_space<vmem>>, vector<8x2xf32>
    tpu.vector_store %arg6[%c0_13, %c0_14], %24 {strides = array<i32>} : memref<8x2xf32, #tpu.memory_space<vmem>>, vector<8x2xf32>,
    return
  }
  func.func @transform_0(%arg0: i32) -> (i32, i32) {
    %c0_i32 = arith.constant 0 : i32
    %c0_i32_0 = arith.constant 0 : i32
    return %arg0, %c0_i32 : i32, i32
  }
  func.func @transform_1(%arg0: i32) -> (i32, i32) {
    %c0_i32 = arith.constant 0 : i32
    %c0_i32_0 = arith.constant 0 : i32
    %c0_i32_1 = arith.constant 0 : i32
    return %c0_i32, %c0_i32_0 : i32, i32
  }
  func.func @transform_2(%arg0: i32) -> (i32, i32) {
    %c0_i32 = arith.constant 0 : i32
    %c0_i32_0 = arith.constant 0 : i32
    %c0_i32_1 = arith.constant 0 : i32
    return %c0_i32, %c0_i32_0 : i32, i32
  }
  func.func @transform_3(%arg0: i32) -> (i32, i32) {
    %c0_i32 = arith.constant 0 : i32
    %c0_i32_0 = arith.constant 0 : i32
    %c0_i32_1 = arith.constant 0 : i32
    return %c0_i32, %c0_i32_0 : i32, i32
  }
  func.func @transform_4(%arg0: i32) -> (i32, i32) {
    %c0_i32 = arith.constant 0 : i32
    %c0_i32_0 = arith.constant 0 : i32
    %c0_i32_1 = arith.constant 0 : i32
    return %c0_i32, %c0_i32_0 : i32, i32
  }
  func.func @transform_5(%arg0: i32) -> (i32, i32) {
    %c0_i32 = arith.constant 0 : i32
    %c0_i32_0 = arith.constant 0 : i32
    return %arg0, %c0_i32 : i32, i32
  }
}

</mosaic_0001>

<bundles_post_ra>
// kernel: tpu_custom_call.1
= control target key start
LH: loop header
LB: loop body
LE: loop exit
PB: predicated region body
PF: predicated region fallthrough
CT: control target
= control target key end

     0   :  { %s864_s18 = smov 0   ;;  %s1220_s0 = inlined_call_operand.vmem [shape: f32[20,784], index: 0, kind: input, shape index: {}]   ;;  %s1221_s1 = inlined_call_operand.vmem [shape: f32[784,10], index: 1, kind: input, shape index: {}]   ;;  %s1222_s2 = inlined_call_operand.vmem [shape: f32[1,10], index: 2, kind: input, shape index: {}]   ;;  %s1223_s3 = inlined_call_operand.vmem [shape: f32[10,2], index: 3, kind: input, shape index: {}]   ;;  %s1224_s4 = inlined_call_operand.vmem [shape: f32[1,2], index: 4, kind: input, shape index: {}]   ;;  %s1225_s5 = inlined_call_operand.vmem [shape: f32[20,2], index: 5, kind: output, shape index: {}]  }
   0x1 LB: > { %s711_s19 = sadd.s32 4294967295, %s830_s18   ;;  %p715_p0 = scmp.ge.s32.totalorder %s830_s18, 1  ;;  %s830_s18 = sphi %s864_s18, %s15_s18  }
   0x2   : > { %p187_p1 = scmp.lt.s32.totalorder %s830_s18, 4 }
   0x4   : > { %p188_p2 = pnand %p715_p0, %p187_p1 }
   0x5   : > { %p928_p3 = scmp.lt.s32.totalorder (!%p188_p2), %s711_s19, 2 }
   0x6   : > { %191 = sbr.rel (%p188_p2) target bundleno = 791 (0x317), region = 40 }
   0xb   : > { %v268_v0 = vld [vmem:[%s1221_s1 + $0xf0] sm:$0xff]  ;;  %v269_v1 = vld [vmem:[%s1221_s1 + $0xf8] sm:$0xff]  ;;  %v266_v11 = vld [vmem:[%s1221_s1 + $0xe0] sm:$0xff]  ;;  %s1228_s19 = smov (!%p928_p3, %s711_s19), 2  ;;  %vm833_vm0 = vmmov 0   ;;  %vm392_vm1 = vcmask 130048  }
   0xc   : > { %v252_v2 = vld [vmem:[%s1221_s1 + $0x70] sm:$0xff]  ;;  %v351_v3 = vpack.c.bf16 %v269_v1, %v268_v0  ;;  %v253_v4 = vld [vmem:[%s1221_s1 + $0x78] sm:$0xff]  ;;  %v267_v13 = vld [vmem:[%s1221_s1 + $0xe8] sm:$0xff]  ;;  %s809_s30 = smul.u32 56, %s1228_s19  ;;  %vm570_vm2 = vcmask 1041408   ;;  %vm566_vm3 = vcmask 80896  }
   0xd   : > { %v300_v5 = vld [vmem:[%s1221_s1 + $0x1f0] sm:$0xff]  ;;  %v301_v6 = vld [vmem:[%s1221_s1 + $0x1f8] sm:$0xff]  ;;  %v343_v7 = vpack.c.bf16 %v253_v4, %v252_v2  ;;  %v250_v14 = vld [vmem:[%s1221_s1 + $0x60] sm:$0xff]  ;;  %v350_v16 = vpack.c.bf16 %v267_v13, %v266_v11  ;;  %vm644_vm4 = vcmask 15360   ;;  %s717_s25 = sshll.u32 %s1228_s19, 3 }
   0xe   : > { %v367_v8 = vpack.c.bf16 %v301_v6, %v300_v5  ;;  %v284_v9 = vld [vmem:[%s1221_s1 + $0x170] sm:$0xff]  ;;  %v285_v10 = vld [vmem:[%s1221_s1 + $0x178] sm:$0xff]  ;;  %725 = vmatprep.subr.bf16.mxu0 %v351_v3  ;;  %v251_v15 = vld [vmem:[%s1221_s1 + $0x68] sm:$0xff]  ;;  %s1029_s26 = scalar_lea.vmem %s1220_s0, %s809_s30  ;;  %s222_s29 = scalar_lea.vmem %s1225_s5, %s717_s25 }
   0xf   : > { %v359_v12 = vpack.c.bf16 %v285_v10, %v284_v9  ;;  %726 = vmatpush3.bf16.msra.mxu0 %v343_v7  ;;  %v342_v17 = vpack.c.bf16 %v251_v15, %v250_v14  ;;  %v298_v18 = vld [vmem:[%s1221_s1 + $0x1e0] sm:$0xff]  ;;  %v299_v19 = vld [vmem:[%s1221_s1 + $0x1e8] sm:$0xff]  ;;  %v264_v23 = vld [vmem:[%s1221_s1 + $0xd0] sm:$0xff] }
  0x10   : > { %747 = vmatprep.subr.bf16.mxu1 %v367_v8  ;;  %v282_v20 = vld [vmem:[%s1221_s1 + $0x160] sm:$0xff]  ;;  %v366_v21 = vpack.c.bf16 %v299_v19, %v298_v18  ;;  %v283_v22 = vld [vmem:[%s1221_s1 + $0x168] sm:$0xff]  ;;  %v265_v24 = vld [vmem:[%s1221_s1 + $0xd8] sm:$0xff]  ;;  %727 = vmatprep.subr.bf16.mxu0 %v350_v16 }
  0x11   : > { %748 = vmatpush3.bf16.msra.mxu1 %v359_v12  ;;  %v358_v25 = vpack.c.bf16 %v283_v22, %v282_v20  ;;  %v349_v26 = vpack.c.bf16 %v265_v24, %v264_v23  ;;  %v248_v27 = vld [vmem:[%s1221_s1 + $0x50] sm:$0xff]  ;;  %v249_v28 = vld [vmem:[%s1221_s1 + $0x58] sm:$0xff]  ;;  %v262_v35 = vld [vmem:[%s1221_s1 + $0xc0] sm:$0xff] }
  0x12   : > { %v296_v29 = vld [vmem:[%s1221_s1 + $0x1d0] sm:$0xff]  ;;  %749 = vmatprep.subr.bf16.mxu1 %v366_v21  ;;  %v297_v30 = vld [vmem:[%s1221_s1 + $0x1d8] sm:$0xff]  ;;  %v341_v33 = vpack.c.bf16 %v249_v28, %v248_v27  ;;  %v263_v36 = vld [vmem:[%s1221_s1 + $0xc8] sm:$0xff] }
  0x13   : > { %v280_v31 = vld [vmem:[%s1221_s1 + $0x150] sm:$0xff]  ;;  %v281_v32 = vld [vmem:[%s1221_s1 + $0x158] sm:$0xff]  ;;  %728 = vmatpush3.bf16.msra.mxu0 %v342_v17  ;;  %v365_v34 = vpack.c.bf16 %v297_v30, %v296_v29  ;;  %v246_v37 = vld [vmem:[%s1221_s1 + $0x40] sm:$0xff]  ;;  %v348_v39 = vpack.c.bf16 %v263_v36, %v262_v35 }
  0x14   : > { %729 = vmatprep.subr.bf16.mxu0 %v349_v26  ;;  %v357_v38 = vpack.c.bf16 %v281_v32, %v280_v31  ;;  %v247_v40 = vld [vmem:[%s1221_s1 + $0x48] sm:$0xff]  ;;  %v294_v41 = vld [vmem:[%s1221_s1 + $0x1c0] sm:$0xff]  ;;  %v260_v46 = vld [vmem:[%s1221_s1 + $0xb0] sm:$0xff] }
  0x15   : > { %750 = vmatpush3.bf16.msra.mxu1 %v358_v25  ;;  %v295_v42 = vld [vmem:[%s1221_s1 + $0x1c8] sm:$0xff]  ;;  %v278_v44 = vld [vmem:[%s1221_s1 + $0x140] sm:$0xff]  ;;  %v261_v47 = vld [vmem:[%s1221_s1 + $0xb8] sm:$0xff]  ;;  %v340_v48 = vpack.c.bf16 %v247_v40, %v246_v37 }
  0x16   : > { %751 = vmatprep.subr.bf16.mxu1 %v365_v34  ;;  %v364_v43 = vpack.c.bf16 %v295_v42, %v294_v41  ;;  %v279_v45 = vld [vmem:[%s1221_s1 + $0x148] sm:$0xff]  ;;  %v292_v49 = vld [vmem:[%s1221_s1 + $0x1b0] sm:$0xff]  ;;  %v293_v50 = vld [vmem:[%s1221_s1 + $0x1b8] sm:$0xff]  ;;  %v347_v52 = vpack.c.bf16 %v261_v47, %v260_v46 }
  0x17   : > { %730 = vmatpush3.bf16.msra.mxu0 %v341_v33  ;;  %v356_v51 = vpack.c.bf16 %v279_v45, %v278_v44  ;;  %v244_v53 = vld [vmem:[%s1221_s1 + $0x30] sm:$0xff]  ;;  %v245_v54 = vld [vmem:[%s1221_s1 + $0x38] sm:$0xff]  ;;  %v363_v56 = vpack.c.bf16 %v293_v50, %v292_v49  ;;  %v258_v58 = vld [vmem:[%s1221_s1 + $0xa0] sm:$0xff] }
  0x18   : > { %731 = vmatprep.subr.bf16.mxu0 %v348_v39  ;;  %v276_v55 = vld [vmem:[%s1221_s1 + $0x130] sm:$0xff]  ;;  %v277_v57 = vld [vmem:[%s1221_s1 + $0x138] sm:$0xff]  ;;  %v259_v59 = vld [vmem:[%s1221_s1 + $0xa8] sm:$0xff]  ;;  %v339_v62 = vpack.c.bf16 %v245_v54, %v244_v53 }
  0x19   : > { %752 = vmatpush3.bf16.msra.mxu1 %v357_v38  ;;  %v290_v60 = vld [vmem:[%s1221_s1 + $0x1a0] sm:$0xff]  ;;  %v291_v61 = vld [vmem:[%s1221_s1 + $0x1a8] sm:$0xff]  ;;  %v355_v63 = vpack.c.bf16 %v277_v57, %v276_v55  ;;  %v346_v0 = vpack.c.bf16 %v259_v59, %v258_v58  ;;  %v256_v6 = vld [vmem:[%s1221_s1 + $0x90] sm:$0xff]  ;;  %v832_v55 = vmov 0.0  }
  0x1a   : > { %753 = vmatprep.subr.bf16.mxu1 %v364_v43  ;;  %v242_v1 = vld [vmem:[%s1221_s1 + $0x20] sm:$0xff]  ;;  %v243_v2 = vld [vmem:[%s1221_s1 + $0x28] sm:$0xff]  ;;  %v362_v4 = vpack.c.bf16 %v291_v61, %v290_v60  ;;  %v257_v7 = vld [vmem:[%s1221_s1 + $0x98] sm:$0xff] }
  0x1b   : > { %732 = vmatpush3.bf16.msra.mxu0 %v340_v48  ;;  %v274_v3 = vld [vmem:[%s1221_s1 + $0x120] sm:$0xff]  ;;  %v275_v5 = vld [vmem:[%s1221_s1 + $0x128] sm:$0xff]  ;;  %v288_v8 = vld [vmem:[%s1221_s1 + $0x190] sm:$0xff]  ;;  %v338_v10 = vpack.c.bf16 %v243_v2, %v242_v1  ;;  %v345_v14 = vpack.c.bf16 %v257_v7, %v256_v6 }
  0x1c   : > { %733 = vmatprep.subr.bf16.mxu0 %v347_v52  ;;  %v289_v9 = vld [vmem:[%s1221_s1 + $0x198] sm:$0xff]  ;;  %v240_v11 = vld [vmem:[%s1221_s1 + $0x10] sm:$0xff]  ;;  %v225_v12 = vld [vmem:[%s1029_s26 + $0x8] sm:$0xff]  ;;  %v354_v13 = vpack.c.bf16 %v275_v5, %v274_v3 }
  0x1d   : > { %754 = vmatpush3.bf16.msra.mxu1 %v356_v51  ;;  %v241_v15 = vld [vmem:[%s1221_s1 + $0x18] sm:$0xff]  ;;  %v272_v16 = vld [vmem:[%s1221_s1 + $0x110] sm:$0xff]  ;;  %v232_v18 = vpack.c.bf16 %v225_v12, %v225_v12  ;;  %v361_v19 = vpack.c.bf16 %v289_v9, %v288_v8  ;;  %v254_v20 = vld [vmem:[%s1221_s1 + $0x80] sm:$0xff] }
  0x1e   : > { %755 = vmatprep.subr.bf16.mxu1 %v363_v56  ;;  %v273_v17 = vld [vmem:[%s1221_s1 + $0x118] sm:$0xff]  ;;  %v255_v21 = vld [vmem:[%s1221_s1 + $0x88] sm:$0xff]  ;;  %v286_v23 = vld [vmem:[%s1221_s1 + $0x180] sm:$0xff]  ;;  %v337_v26 = vpack.c.bf16 %v241_v15, %v240_v11 }
  0x1f   : > { %734 = vmatpush3.bf16.msra.mxu0 %v339_v62  ;;  %v227_v22 = vld [vmem:[%s1029_s26 + $0x18] sm:$0xff]  ;;  %v287_v24 = vld [vmem:[%s1221_s1 + $0x188] sm:$0xff]  ;;  %428 = vmatprep.mubr.bf16.mxu0 %v232_v18  ;;  %v353_v27 = vpack.c.bf16 %v273_v17, %v272_v16  ;;  %v344_v28 = vpack.c.bf16 %v255_v21, %v254_v20  ;;  %v238_v29 = vld [vmem:[%s1221_s1] sm:$0xff] }
  0x20   : > { %735 = vmatprep.subr.bf16.mxu0 %v346_v0  ;;  %v234_v25 = vpack.c.bf16 %v227_v22, %v227_v22  ;;  %v239_v30 = vld [vmem:[%s1221_s1 + $0x8] sm:$0xff]  ;;  %v270_v31 = vld [vmem:[%s1221_s1 + $0x100] sm:$0xff]  ;;  %v360_v32 = vpack.c.bf16 %v287_v24, %v286_v23  ;;  %v332_v34 = vld [vmem:[%s1221_s1 + $0x2f0] sm:$0xff] }
  0x21   : > { %756 = vmatpush3.bf16.msra.mxu1 %v355_v63  ;;  %v271_v33 = vld [vmem:[%s1221_s1 + $0x108] sm:$0xff]  ;;  %v333_v35 = vld [vmem:[%s1221_s1 + $0x2f8] sm:$0xff]  ;;  %v336_v36 = vpack.c.bf16 %v239_v30, %v238_v29  ;;  %v224_v37 = vld [vmem:[%s1029_s26] sm:$0xff] }
  0x22   : > { %757 = vmatprep.subr.bf16.mxu1 %v362_v4  ;;  %468 = vmatprep.mubr.bf16.mxu1 %v234_v25  ;;  %v352_v38 = vpack.c.bf16 %v271_v33, %v270_v31  ;;  %v383_v39 = vpack.c.bf16 %v333_v35, %v332_v34  ;;  %v316_v40 = vld [vmem:[%s1221_s1 + $0x270] sm:$0xff]  ;;  %v317_v41 = vld [vmem:[%s1221_s1 + $0x278] sm:$0xff]  ;;  %v330_v43 = vld [vmem:[%s1221_s1 + $0x2e0] sm:$0xff]  ;;  %v231_v45 = vpack.c.bf16 %v224_v37, %v224_v37 }
  0x23   : > { %736 = vmatpush3.bf16.msra.mxu0 %v338_v10  ;;  %v226_v42 = vld [vmem:[%s1029_s26 + $0x10] sm:$0xff]  ;;  %v331_v44 = vld [vmem:[%s1221_s1 + $0x2e8] sm:$0xff]  ;;  %v375_v46 = vpack.c.bf16 %v317_v41, %v316_v40  ;;  %v314_v48 = vld [vmem:[%s1221_s1 + $0x260] sm:$0xff] }
  0x24   : > { %737 = vmatprep.subr.bf16.mxu0 %v345_v14  ;;  %v233_v47 = vpack.c.bf16 %v226_v42, %v226_v42  ;;  %v382_v49 = vpack.c.bf16 %v331_v44, %v330_v43  ;;  %v315_v50 = vld [vmem:[%s1221_s1 + $0x268] sm:$0xff]  ;;  %v334_v51 = vld [vmem:[%s1221_s1 + $0x300] sm:$0xff]  ;;  %v328_v53 = vld [vmem:[%s1221_s1 + $0x2d0] sm:$0xff] }
  0x25   : > { %758 = vmatpush3.bf16.msra.mxu1 %v354_v13  ;;  %v335_v52 = vld [vmem:[%s1221_s1 + $0x308] sm:$0xff]  ;;  %v329_v54 = vld [vmem:[%s1221_s1 + $0x2d8] sm:$0xff]  ;;  %v374_v59 = vpack.c.bf16 %v315_v50, %v314_v48  ;;  %v312_v61 = vld [vmem:[%s1221_s1 + $0x250] sm:$0xff] }
  0x26   : > { %759 = vmatprep.subr.bf16.mxu1 %v361_v19  ;;  %v384_v56 = vpack.c.bf16 %v335_v52, %v334_v51  ;;  %v229_v57 = vld [vmem:[%s1029_s26 + $0x28] sm:$0xff]  ;;  %v381_v60 = vpack.c.bf16 %v329_v54, %v328_v53  ;;  %v313_v62 = vld [vmem:[%s1221_s1 + $0x258] sm:$0xff]  ;;  %v230_v63 = vld [vmem:[%s1029_s26 + $0x30] sm:$0xff] }
  0x27   : > { %738 = vmatpush3.bf16.msra.mxu0 %v337_v26  ;;  %v236_v58 = vpack.c.bf16 %v229_v57, %v229_v57  ;;  %v326_v0 = vld [vmem:[%s1221_s1 + $0x2c0] sm:$0xff]  ;;  %v327_v1 = vld [vmem:[%s1221_s1 + $0x2c8] sm:$0xff]  ;;  %v373_v2 = vpack.c.bf16 %v313_v62, %v312_v61  ;;  %v237_v3 = vpack.c.bf16 %v230_v63, %v230_v63  ;;  %v324_v7 = vld [vmem:[%s1221_s1 + $0x2b0] sm:$0xff] }
  0x28   : > { %739 = vmatprep.subr.bf16.mxu0 %v344_v28  ;;  %v380_v4 = vpack.c.bf16 %v327_v1, %v326_v0  ;;  %v310_v5 = vld [vmem:[%s1221_s1 + $0x240] sm:$0xff]  ;;  %v311_v6 = vld [vmem:[%s1221_s1 + $0x248] sm:$0xff]  ;;  %v325_v8 = vld [vmem:[%s1221_s1 + $0x2b8] sm:$0xff] }
  0x29   : > { %760 = vmatpush3.bf16.msra.mxu1 %v353_v27  ;;  %v372_v9 = vpack.c.bf16 %v311_v6, %v310_v5  ;;  %v379_v10 = vpack.c.bf16 %v325_v8, %v324_v7  ;;  %v308_v11 = vld [vmem:[%s1221_s1 + $0x230] sm:$0xff]  ;;  %v309_v12 = vld [vmem:[%s1221_s1 + $0x238] sm:$0xff]  ;;  %v322_v13 = vld [vmem:[%s1221_s1 + $0x2a0] sm:$0xff] }
  0x2a   : > { %761 = vmatprep.subr.bf16.mxu1 %v360_v32  ;;  %v323_v14 = vld [vmem:[%s1221_s1 + $0x2a8] sm:$0xff]  ;;  %v371_v15 = vpack.c.bf16 %v309_v12, %v308_v11  ;;  %v306_v17 = vld [vmem:[%s1221_s1 + $0x220] sm:$0xff]  ;;  %v320_v19 = vld [vmem:[%s1221_s1 + $0x290] sm:$0xff] }
  0x2b   : > { %740 = vmatpush3.bf16.msra.mxu0 %v336_v36  ;;  %v378_v16 = vpack.c.bf16 %v323_v14, %v322_v13  ;;  %v307_v18 = vld [vmem:[%s1221_s1 + $0x228] sm:$0xff]  ;;  %v321_v20 = vld [vmem:[%s1221_s1 + $0x298] sm:$0xff]  ;;  %v304_v23 = vld [vmem:[%s1221_s1 + $0x210] sm:$0xff] }
  0x2c   : > { %769 = vmatprep.subr.bf16.mxu0 %v383_v39  ;;  %v370_v21 = vpack.c.bf16 %v307_v18, %v306_v17  ;;  %v377_v22 = vpack.c.bf16 %v321_v20, %v320_v19  ;;  %v305_v24 = vld [vmem:[%s1221_s1 + $0x218] sm:$0xff]  ;;  %v318_v25 = vld [vmem:[%s1221_s1 + $0x280] sm:$0xff]  ;;  %v319_v26 = vld [vmem:[%s1221_s1 + $0x288] sm:$0xff] }
  0x2d   : > { %762 = vmatpush3.bf16.msra.mxu1 %v352_v38  ;;  %v369_v27 = vpack.c.bf16 %v305_v24, %v304_v23  ;;  %v376_v28 = vpack.c.bf16 %v319_v26, %v318_v25  ;;  %v302_v29 = vld [vmem:[%s1221_s1 + $0x200] sm:$0xff]  ;;  %v303_v30 = vld [vmem:[%s1221_s1 + $0x208] sm:$0xff] }
  0x2e   : > { %796 = vmatprep.subr.bf16.mxu1 %v832_v55  ;;  %429 = vmatmul.mubr.bf16.vlgmr.msra.gmra.mxu0 %v231_v45  ;;  %v368_v31 = vpack.c.bf16 %v303_v30, %v302_v29  ;;  %v228_v32 = vld [vmem:[%s1029_s26 + $0x20] sm:$0xff]  ;;  %v558_v34 = vld [vmem:[%s1223_s3 + $0x8] sm:$0x3] }
  0x2f   : > { %770 = vmatpush3.bf16.msra.mxu0 %v375_v46  ;;  %508 = vmatprep.mubr.bf16.mxu0 %v236_v58  ;;  %v235_v33 = vpack.c.bf16 %v228_v32, %v228_v32  ;;  %v557_v35 = vld [vmem:[%s1223_s3] sm:$0xff] }
  0x30   : > { %469 = vmatmul.mubr.bf16.vlgmr.msra.gmra.mxu1 %v233_v47  ;;  %771 = vmatprep.subr.bf16.mxu0 %v382_v49  ;;  %v718_v49 = vld [vmem:[%s1222_s2] ss:$0 sm:$0xff] }
  0x31   : > { %797 = vmatpush3.bf16.msra.mxu1 %v384_v56  ;;  %798 = vmatprep.mubr.msk.bf16.mxu1 %vm833_vm0, %v832_v55  ;;  %v720_v61 = vld [vmem:[%s1224_s4] ss:$0 sm:$0xff] }
  0x32   : > { %802 = vmatprep.subr.mxu1 %v832_v55 }
  0x33   : > { %772 = vmatpush3.bf16.msra.mxu0 %v374_v59 }
  0x34   : > { %773 = vmatprep.subr.bf16.mxu0 %v381_v60 }
  0x37   : > { %774 = vmatpush3.bf16.msra.mxu0 %v373_v2 }
  0x38   : > { %799 = vmatmul.mubr.msk.bf16.vlgmr.msra.gmra.mxu1 %vm392_vm1, %v237_v3  ;;  %775 = vmatprep.subr.bf16.mxu0 %v380_v4 }
  0x39   : > { %806 = vmatprep.mubr.msk.f32.mxu1 %vm833_vm0, %v832_v55  ;;  %803 = vmatpush3.msk.msra.mxu1 %vm570_vm2, %v558_v34 }
  0x3a   : > { %804 = vmatprep.subr.mxu1 %v832_v55 }
  0x3b   : > { %776 = vmatpush3.bf16.msra.mxu0 %v372_v9  ;;  %805 = vmatpush3.msra.mxu1 %v557_v35 }
  0x3c   : > { %777 = vmatprep.subr.bf16.mxu0 %v379_v10 }
  0x3f   : > { %778 = vmatpush3.bf16.msra.mxu0 %v371_v15 }
  0x40   : > { %779 = vmatprep.subr.bf16.mxu0 %v378_v16 }
  0x43   : > { %780 = vmatpush3.bf16.msra.mxu0 %v370_v21 }
  0x44   : > { %781 = vmatprep.subr.bf16.mxu0 %v377_v22 }
  0x47   : > { %782 = vmatpush3.bf16.msra.mxu0 %v369_v27 }
  0x48   : > { %783 = vmatprep.subr.bf16.mxu0 %v376_v28 }
  0x4b   : > { %784 = vmatpush3.bf16.msra.mxu0 %v368_v31 }
  0x4e   : > { %509 = vmatmul.mubr.bf16.vlgmr.msra.gmra.mxu0 %v235_v33 }
  0xee   : > { %v741_v36 = vpop.f32.mrf.mxu0 }
  0xf0   : > { %v763_v37 = vpop.f32.mrf.mxu1  ;;  %v742_v38 = vpop.f32.mrf.mxu0 }
  0xf1   : > { %v743_v48 = vadd.f32 %v742_v38, %v741_v36 }
  0xf2   : > { %v764_v39 = vpop.f32.mrf.mxu1  ;;  %v744_v40 = vpop.f32.mrf.mxu0 }
  0xf3   : > { %v431_v50 = vadd.f32 %v743_v48, %v718_v49  ;;  %v765_v51 = vadd.f32 %v764_v39, %v763_v37 }
  0xf4   : > { %v766_v41 = vpop.f32.mrf.mxu1  ;;  %v745_v42 = vpop.f32.mrf.mxu0 }
  0xf5   : > { %v471_v54 = vadd.f32 %v765_v51, %v431_v50 }
  0xf6   : > { %v767_v43 = vpop.f32.mrf.mxu1 }
  0xf8   : > { %v550_v44 = vpop.f32.mrf.mxu1 }
  0xfa   : > { %v800_v45 = vpop.f32.mrf.mxu1 }
  0xfc   : > { %v553_v46 = vpop.f32.mrf.mxu1 }
  0xfe   : > { %v801_v47 = vpop.f32.mrf.mxu1 }
 0x10e   : > { %v785_v52 = vpop.f32.mrf.mxu0 }
 0x110   : > { %v786_v53 = vpop.f32.mrf.mxu0 }
 0x111   : > { %v787_v55 = vadd.f32 %v786_v53, %v785_v52 }
 0x112   : > { %v788_v56 = vpop.f32.mrf.mxu0 }
 0x113   : > { %v511_v57 = vadd.f32 %v787_v55, %v471_v54 }
 0x114   : > { %v789_v58 = vpop.f32.mrf.mxu0 }
 0x115   : > { %v551_v59 = vadd.f32 %v550_v44, %v511_v57 }
 0x117   : > { %v556_v60 = vmax.f32 %v551_v59, 0.0 }
 0x119   : > { %807 = vmatmul.mubr.msk.f32.vlgmr.msra.gmra.mxu1 %vm566_vm3, %v556_v60 }
 0x1d9   : > { %v640_v62 = vpop.f32.mrf.mxu1 }
 0x1da   : > { %v641_v63 = vadd.f32 %v720_v61, %v640_v62 }
 0x1db   : > { %v808_v0 = vpop.f32.mrf.mxu1 }
 0x1dc   : > { %v645_v1 = vsel %vm644_vm4, %v641_v63, -inf }
 0x1dd   : > { %646 = vmax.xlane.f32.xlu0 %v645_v1 }
 0x266   : > { %v647_v2 = vpop.xlane.xlu0 %646 }
 0x267   : > { %v648_v3 = vsub.f32 %v641_v63, %v647_v2 }
 0x269   : > { %v649_v4 = vmul.f32 1.442695, %v648_v3 }
 0x26b   : > { %820 = vpow2.f32 %v649_v4 }
 0x278   : > { %v821_v5 = vpop.eup %820 }
 0x279   : > { %v651_v6 = vsel %vm644_vm4, %v821_v5, 0.0 }
 0x27a   : > { %652 = vadd.xlane.f32.xlu0 %v651_v6 }
 0x303   : > { %v653_v7 = vpop.xlane.xlu0 %652 }
 0x304   : > { %822 = vlog2.f32 %v653_v7 }
 0x311   : > { %v823_v8 = vpop.eup %822 }
 0x312   : > { %v655_v9 = vmul.f32 0.6931472, %v823_v8 }
 0x314   : > { %v656_v10 = vsub.f32 %v648_v3, %v655_v9 }
 0x316   : > { %657 = vst.msk [vmem:[%s222_s29] sm:$0xff] %vm644_vm4, %v656_v10 }
 0x317 PF: > { %s15_s18 = sadd.s32 1, %s830_s18  }
 0x318   : > { %p12_p4 = scmp.ge.s32.totalorder %s15_s18, 5  }
 0x31a   :  { %14 = sbr.rel (!%p12_p4) target bundleno = 1 (0x1), region = 70 }

</bundles_post_ra>
